<compile_context>
chip_gen: v5e
topology: v5e:2x2
jax: 0.10.0
libtpu: 0.0.40
codegen_flags: <defaults>
</compile_context>

<pallas_src>
import jax
import jax.numpy as jnp
from jax.experimental import pallas as pl
from jax.experimental.pallas import tpu as pltpu


# Below this element count the pallas_call launch overhead dominates; use XLA.
SMALL_N_THRESHOLD = 1 << 16            # 64K elements

# ~1 MiB f32 per block (input); in+out double-buffered = 4 MiB VMEM.
BLOCK_ELEMS = 2048 * 128

LANES = 128                            # vreg lane width
WIDE_LANES = 1024                      # wider rows when the size allows it


def _transition_kernel(mult_ref, x_ref, loc_ref):
    # mult_ref: (1,) f32 scalar in SMEM; x_ref/loc_ref: (block_rows, cols) VMEM.
    # Cast the scalar to the input dtype so narrow-dtype math stays packed.
    m = mult_ref[0].astype(x_ref.dtype)
    loc_ref[...] = (m * x_ref[...]).astype(loc_ref.dtype)


class NormalFullyExpanded:
    """Stand-in for torch.distributions.Normal tagged FULLY_EXPANDED.

    `scale` is kept as the scalar parameter exactly like the PyTorch module;
    Normal broadcasts a scalar scale against `loc`, so values are identical.
    """

    batch_shape_mode = "FULLY_EXPANDED"

    def __init__(self, loc, scale):
        self.loc = loc
        self.scale = scale

    def log_prob(self, value):
        scale = jnp.asarray(self.scale, self.loc.dtype)
        var = scale * scale
        return (
            -0.5 * (value - self.loc) ** 2 / var
            - jnp.log(scale)
            - 0.5 * jnp.log(2.0 * jnp.pi).astype(self.loc.dtype)
        )

    def sample(self, key):
        scale = jnp.asarray(self.scale, self.loc.dtype)
        return self.loc + scale * jax.random.normal(
            key, self.loc.shape, self.loc.dtype
        )


def _scale_by_mult_pallas(x, mult):
    """loc = mult * x via a lane-dense, tiled Pallas kernel (large inputs)."""
    orig_shape = x.shape
    dtype = x.dtype
    n = int(x.size)

    # Lane-dense slab: prefer wide 1024-lane rows when the size divides evenly.
    cols = WIDE_LANES if n % WIDE_LANES == 0 else LANES

    x_flat = x.reshape(-1)
    pad = (-n) % cols                  # lane-tail pad only when actually needed
    if pad:
        x_flat = jnp.pad(x_flat, (0, pad))
    rows = (n + pad) // cols
    x2d = x_flat.reshape(rows, cols)

    # Biggest block under the VMEM budget.  If a single block covers the full
    # row extent, use it directly (no multiple-of-8 requirement in that case);
    # otherwise block_rows is a multiple of 8 and the ragged last block is
    # masked by Pallas (grid = cdiv, no row padding).
    max_block_rows = max(BLOCK_ELEMS // cols, 8)
    block_rows = rows if rows <= max_block_rows else max_block_rows

    grid = (pl.cdiv(rows, block_rows),)
    tile_spec = pl.BlockSpec((block_rows, cols), lambda i: (i, 0))

    # Runtime scalar operand (SMEM) -> no recompile when mult changes.
    mult_arr = jnp.asarray(mult, dtype=jnp.float32).reshape(1)

    itemsize = jnp.dtype(dtype).itemsize
    cost = pl.CostEstimate(
        flops=n, transcendentals=0, bytes_accessed=2 * n * itemsize
    )

    loc2d = pl.pallas_call(
        _transition_kernel,
        out_shape=jax.ShapeDtypeStruct((rows, cols), dtype),
        grid=grid,
        in_specs=[
            pl.BlockSpec(memory_space=pltpu.MemorySpace.SMEM),  # mult scalar
            tile_spec,                                          # x slab
        ],
        out_specs=tile_spec,
        compiler_params=pltpu.CompilerParams(
            dimension_semantics=("parallel",),
        ),
        cost_estimate=cost,
    )(mult_arr, x2d)

    loc_flat = loc2d.reshape(-1)
    if pad:
        loc_flat = loc_flat[:n]
    return loc_flat.reshape(orig_shape)


def _scale_by_mult(x, mult, *, force_pallas=False):
    """loc = mult * x.  Tiny inputs use plain XLA; large slabs use Pallas."""
    if not force_pallas and x.size < SMALL_N_THRESHOLD:
        # Standalone kernel dispatch would dwarf the work at this size.
        return jnp.asarray(mult, x.dtype) * x
    return _scale_by_mult_pallas(x, mult)


def transition_forward(previous_latents, *, init_mult, scale,
                       force_pallas=False):
    """Mirrors Transition.forward: uses previous_latents[-1]."""
    x = previous_latents[-1]
    loc = _scale_by_mult(x, init_mult, force_pallas=force_pallas)
    return NormalFullyExpanded(loc, jnp.asarray(scale, x.dtype))


if __name__ == "__main__":
    key = jax.random.PRNGKey(0)
    init_mult = 0.9
    scale_param = 0.5

    # --- model-sized latents: [batch, num_particles, latent_dim] (XLA fast path)
    B, P, D = 2, 8, 16
    k0, k1 = jax.random.split(key)
    previous_latents = [
        jax.random.normal(k0, (B, P, D), jnp.float32),
        jax.random.normal(k1, (B, P, D), jnp.float32),
    ]
    dist = transition_forward(
        previous_latents, init_mult=init_mult, scale=scale_param
    )
    jax.block_until_ready(dist.loc)
    ref_loc = init_mult * previous_latents[-1]
    assert jnp.allclose(dist.loc, ref_loc, atol=1e-6)
    assert jnp.allclose(dist.scale, scale_param, atol=1e-6)

    # --- same tiny input, forced through the Pallas kernel (single full block)
    dist_pk = transition_forward(
        previous_latents, init_mult=init_mult, scale=scale_param,
        force_pallas=True,
    )
    jax.block_until_ready(dist_pk.loc)
    assert jnp.allclose(dist_pk.loc, ref_loc, atol=1e-6)

    # --- odd size: exercises the lane-tail pad + [:n] slice path (231 elems)
    k2 = jax.random.fold_in(key, 2)
    x_odd = jax.random.normal(k2, (3, 7, 11), jnp.float32)
    loc_odd = _scale_by_mult(x_odd, init_mult, force_pallas=True)
    jax.block_until_ready(loc_odd)
    assert jnp.allclose(loc_odd, init_mult * x_odd, atol=1e-6)

    # --- large slab: wide 1024-lane rows, multi-block grid with ragged last
    #     block (rows=300, block_rows=256 -> grid=2), no row padding.
    k3 = jax.random.fold_in(key, 3)
    x_big = jax.random.normal(k3, (8, 300, 128), jnp.float32)  # 307200 elems
    loc_big = _scale_by_mult(x_big, init_mult)                 # Pallas path
    jax.block_until_ready(loc_big)
    assert jnp.allclose(loc_big, init_mult * x_big, atol=1e-6)

    print("KERNEL_OK")
</pallas_src>

<mosaic_0001>
module attributes {stable_mosaic.version = 11 : i64} {
  func.func @_transition_kernel(%arg0: i32, %arg1: memref<1xf32, #tpu.memory_space<smem>>, %arg2: memref<2x128xf32, #tpu.memory_space<vmem>>, %arg3: memref<2x128xf32, #tpu.memory_space<vmem>>) attributes {dimension_semantics = [#tpu.dimension_semantics<parallel>], iteration_bounds = array<i64: 1>, scalar_prefetch = 0 : i64, scratch_operands = 0 : i64, tpu.core_type = #tpu.core_type<tc>, window_params = [{transform_indices = @transform_0, window_bounds = array<i64: 1>}, {transform_indices = @transform_1, window_bounds = array<i64: 2, 128>}, {transform_indices = @transform_2, window_bounds = array<i64: 2, 128>}]} {
    %c0 = arith.constant 0 : index
    %0 = memref.load %arg1[%c0] : memref<1xf32, #tpu.memory_space<smem>>
    %c0_0 = arith.constant 0 : index
    %c0_1 = arith.constant 0 : index
    %1 = vector.load %arg2[%c0_0, %c0_1] : memref<2x128xf32, #tpu.memory_space<vmem>>, vector<2x128xf32>
    %2 = vector.broadcast %0 : f32 to vector<2x128xf32>
    %3 = arith.mulf %2, %1 : vector<2x128xf32>
    %c0_2 = arith.constant 0 : index
    %c0_3 = arith.constant 0 : index
    %4 = vector.load %arg3[%c0_2, %c0_3] : memref<2x128xf32, #tpu.memory_space<vmem>>, vector<2x128xf32>
    tpu.vector_store %arg3[%c0_2, %c0_3], %3 {strides = array<i32>} : memref<2x128xf32, #tpu.memory_space<vmem>>, vector<2x128xf32>,
    return
  }
  func.func @transform_0(%arg0: i32) -> i32 {
    %c0_i32 = arith.constant 0 : i32
    %c0_i32_0 = arith.constant 0 : i32
    return %c0_i32 : i32
  }
  func.func @transform_1(%arg0: i32) -> (i32, i32) {
    %c0_i32 = arith.constant 0 : i32
    %c0_i32_0 = arith.constant 0 : i32
    return %arg0, %c0_i32 : i32, i32
  }
  func.func @transform_2(%arg0: i32) -> (i32, i32) {
    %c0_i32 = arith.constant 0 : i32
    %c0_i32_0 = arith.constant 0 : i32
    return %arg0, %c0_i32 : i32, i32
  }
}

</mosaic_0001>

<bundles_post_ra>
// kernel: tpu_custom_call.1
= control target key start
LH: loop header
LB: loop body
LE: loop exit
PB: predicated region body
PF: predicated region fallthrough
CT: control target
= control target key end

     0   :  { %s86_s0 = inlined_call_operand.<no memory space> [shape: f32[1], index: 0, kind: input, shape index: {}]   ;;  %s87_s1 = inlined_call_operand.vmem [shape: f32[2,128], index: 1, kind: input, shape index: {}]   ;;  %s88_s2 = inlined_call_operand.hbm [shape: f32[2,128], index: 2, kind: output, shape index: {}]  }
   0x1   :  { %v14_v0 = vld [vmem:[%s87_s1] sm:$0x3]  ;;  %v15_v1 = vstv %s86_s0 }
   0x2   :  { %8 = vsyncpa [#allocation4], 0  ;;  %s25_s15 = sshll.u32 %s88_s2, 4  ;;  %v16_v2 = vmul.f32 %v15_v1, %v14_v0  ;;  %s61_s16 = smov [#allocation3]   ;;  %s26_s15 = int_to_ptr.hbm [resolvable:$true] %s25_s15 }
   0x3   :  { %s23_s17 = sshll.u32 %s61_s16, 4  ;;  %s24_s17 = int_to_ptr.vmem [resolvable:$true] %s23_s17 }
   0x4   :  { %17 = vst [vmem:[#allocation3] sm:$0x3] %v16_v2 }
   0x5   :  { %28 = dma.vmem_to_hbm [thread:$0]  %s24_s17, 32, %s26_s15, [#allocation4]  }
   0x6   :  { %59 = dma.done.wait [#allocation4], 32  }
   0x7   :  { %60 = vsyncadd [#allocation4], 4294967264 }
   0x8   :  { %33 = vsyncpa [#allocation4], 1 }

</bundles_post_ra>
